<compile_context>
chip_gen: v6e
topology: v6e:2x2x1
jax: 0.10.0
libtpu: 0.0.40
codegen_flags: <defaults>
</compile_context>

<pallas_src>
import jax
import jax.numpy as jnp
from jax.experimental import pallas as pl
from jax.experimental.pallas import tpu as pltpu


_LANE_COLS = 1024          # lane-dense last dim: 8 x 128 lanes
_MAX_TILE_ROWS = 512       # (512, 1024) f32 = 2 MiB/buffer -> 8 MiB total (v5e-safe)
_TINY_FASTPATH_ELEMS = 1 << 16  # below this, pallas_call overhead dominates


def _square_kernel(x_ref, o_ref):
    x = x_ref[...]
    o_ref[...] = x * x


def _sublane_multiple(dtype) -> int:
    # Rows packed per vreg: 8 for 32-bit, 16 for 16-bit, 32 for 8-bit dtypes.
    itemsize = jnp.dtype(dtype).itemsize
    return max(8, 32 // max(itemsize, 1))


def act_square(x: jax.Array, *, force_pallas: bool = False) -> jax.Array:
    """Elementwise square via a Pallas TPU kernel. Preserves shape & dtype."""
    if x.size == 0:
        return jnp.square(x)

    # Tiny-input fast path: let XLA fuse the square into neighbouring ops.
    # TODO(synk): the real win for ShallowConvNet is fusing this square into the
    # preceding conv/matmul epilogue kernel rather than a standalone launch.
    if not force_pallas and x.size < _TINY_FASTPATH_ELEMS:
        return jnp.square(x)

    orig_shape = x.shape
    dtype = x.dtype
    total = x.size

    cols = _LANE_COLS
    sub = _sublane_multiple(dtype)

    rows = -(-total // cols)                       # ceil-div
    if rows <= _MAX_TILE_ROWS:
        # Single block: round rows up to the sublane packing multiple.
        tile_rows = -(-rows // sub) * sub
    else:
        tile_rows = _MAX_TILE_ROWS                 # multiple of 8 and 16
    rows_padded = -(-rows // tile_rows) * tile_rows

    flat = x.reshape(-1)
    pad = rows_padded * cols - total
    if pad:
        flat = jnp.pad(flat, (0, pad))
    x2d = flat.reshape(rows_padded, cols)

    grid = (rows_padded // tile_rows,)

    out2d = pl.pallas_call(
        _square_kernel,
        out_shape=jax.ShapeDtypeStruct((rows_padded, cols), dtype),
        grid=grid,
        in_specs=[pl.BlockSpec((tile_rows, cols), lambda i: (i, 0))],
        out_specs=pl.BlockSpec((tile_rows, cols), lambda i: (i, 0)),
        compiler_params=pltpu.CompilerParams(
            dimension_semantics=("parallel",),     # megacore sharding on v7x
        ),
    )(x2d)

    out_flat = out2d.reshape(-1)
    if pad:
        out_flat = out_flat[:total]
    return out_flat.reshape(orig_shape)


if __name__ == "__main__":
    key = jax.random.PRNGKey(0)
    k1, k2, k3 = jax.random.split(key, 3)

    # Primary small NCHW input consistent with ShallowConvNet's activation.
    x = jax.random.normal(k1, (2, 4, 16, 16), dtype=jnp.float32)
    y = jax.block_until_ready(act_square(x, force_pallas=True))  # exercise Pallas path
    assert y.shape == x.shape and y.dtype == x.dtype
    assert jnp.allclose(y, jnp.square(x), atol=0, rtol=0), "f32 mismatch vs reference"

    # Larger slab: exercises the multi-step tiled grid + padding path.
    x_big = jax.random.normal(k2, (4, 16, 64, 130), dtype=jnp.float32)
    y_big = jax.block_until_ready(act_square(x_big))
    assert jnp.allclose(y_big, jnp.square(x_big), atol=0, rtol=0), "tiled mismatch"

    # bf16 path stays bf16 end-to-end (halves HBM bytes moved).
    x_bf = jax.random.normal(k3, (2, 4, 16, 16), dtype=jnp.bfloat16)
    y_bf = jax.block_until_ready(act_square(x_bf, force_pallas=True))
    assert y_bf.shape == x_bf.shape and y_bf.dtype == jnp.bfloat16
    assert jnp.allclose(y_bf.astype(jnp.float32),
                        jnp.square(x_bf).astype(jnp.float32), rtol=1e-2), "bf16 mismatch"

    print("KERNEL_OK")
</pallas_src>

<mosaic_0001>
module attributes {stable_mosaic.version = 11 : i64} {
  func.func @_square_kernel(%arg0: i32, %arg1: memref<8x1024xf32, #tpu.memory_space<vmem>>, %arg2: memref<8x1024xf32, #tpu.memory_space<vmem>>) attributes {dimension_semantics = [#tpu.dimension_semantics<parallel>], iteration_bounds = array<i64: 1>, scalar_prefetch = 0 : i64, scratch_operands = 0 : i64, tpu.core_type = #tpu.core_type<tc>, window_params = [{transform_indices = @transform_0, window_bounds = array<i64: 8, 1024>}, {transform_indices = @transform_1, window_bounds = array<i64: 8, 1024>}]} {
    %c0 = arith.constant 0 : index
    %c0_0 = arith.constant 0 : index
    %0 = vector.load %arg1[%c0, %c0_0] : memref<8x1024xf32, #tpu.memory_space<vmem>>, vector<8x1024xf32>
    %1 = arith.mulf %0, %0 : vector<8x1024xf32>
    %c0_1 = arith.constant 0 : index
    %c0_2 = arith.constant 0 : index
    %2 = vector.load %arg2[%c0_1, %c0_2] : memref<8x1024xf32, #tpu.memory_space<vmem>>, vector<8x1024xf32>
    tpu.vector_store %arg2[%c0_1, %c0_2], %1 {strides = array<i32>} : memref<8x1024xf32, #tpu.memory_space<vmem>>, vector<8x1024xf32>,
    return
  }
  func.func @transform_0(%arg0: i32) -> (i32, i32) {
    %c0_i32 = arith.constant 0 : i32
    %c0_i32_0 = arith.constant 0 : i32
    return %arg0, %c0_i32 : i32, i32
  }
  func.func @transform_1(%arg0: i32) -> (i32, i32) {
    %c0_i32 = arith.constant 0 : i32
    %c0_i32_0 = arith.constant 0 : i32
    return %arg0, %c0_i32 : i32, i32
  }
}

</mosaic_0001>

<bundles_post_ra>
// kernel: tpu_custom_call.1
= control target key start
LH: loop header
LB: loop body
LE: loop exit
PB: predicated region body
PF: predicated region fallthrough
CT: control target
= control target key end

     0   :  { %6 = vsyncpa [#allocation3], 0  ;;  %s124_s0 = inlined_call_operand.hbm [shape: f32[8,1024], index: 0, kind: input, shape index: {}]   ;;  %s125_s1 = inlined_call_operand.hbm [shape: f32[8,1024], index: 1, kind: output, shape index: {}]  }
   0x1   :  { %7 = vsyncpa [#allocation4], 0  ;;  %s106_s6 = smov [#allocation2]  }
   0x2   :  { %s14_s7 = sshll.u32 %s106_s6, 4  ;;  %s15_s7 = int_to_ptr.vmem [resolvable:$true] %s14_s7 }
   0x3   :  { %s70_s8 = scalar_lea.vmem %s15_s7, 1024  ;;  %p75_p1 = scmp.lt.s32.totalorder %s15_s7, %s15_s7 }
   0x4   :  { %p71_p0 = scmp.ne.s32.totalorder %s15_s7, %s70_s8  ;;  %p76_p2 = scmp.lt.s32.totalorder %s70_s8, %s70_s8 }
   0x6   :  { %p77_p3 = por %p76_p2, %p75_p1 }
   0x8   :  { %p78_p4 = pnand %p77_p3, %p71_p0 }
   0xa   :  { %81 = shalt.err (!%p78_p4)
}
   0xb   :  { %17 = dma.hbm_to_vmem [thread:$0]  %s124_s0, 1024, %s15_s7, [#allocation3]  }
   0xc   :  { %102 = dma.done.wait [#allocation3], 1024  }
   0xd   :  { %103 = vsyncadd [#allocation3], 4294966272  ;;  %v21_v0 = vld [vmem:[#allocation2] sm:$0xff]  ;;  %v22_v1 = vld [vmem:[#allocation2 + $0x8] sm:$0xff]  ;;  %s107_s11 = smov [#allocation5]  }
   0xe   :  { %v23_v2 = vld [vmem:[#allocation2 + $0x10] sm:$0xff]  ;;  %s51_s12 = sshll.u32 %s107_s11, 4  ;;  %v29_v3 = vmul.f32 %v21_v0, %v21_v0  ;;  %v30_v4 = vmul.f32 %v22_v1, %v22_v1  ;;  %v24_v6 = vld [vmem:[#allocation2 + $0x18] sm:$0xff]  ;;  %v25_v7 = vld [vmem:[#allocation2 + $0x20] sm:$0xff]  ;;  %s52_s12 = int_to_ptr.vmem [resolvable:$true] %s51_s12 }
   0xf   :  { %v31_v5 = vmul.f32 %v23_v2, %v23_v2  ;;  %v26_v8 = vld [vmem:[#allocation2 + $0x28] sm:$0xff]  ;;  %v32_v9 = vmul.f32 %v24_v6, %v24_v6  ;;  %v33_v10 = vmul.f32 %v25_v7, %v25_v7  ;;  %v27_v12 = vld [vmem:[#allocation2 + $0x30] sm:$0xff]  ;;  %v28_v13 = vld [vmem:[#allocation2 + $0x38] sm:$0xff]  ;;  %s82_s0 = scalar_lea.vmem %s52_s12, 1024  ;;  %p87_p6 = scmp.lt.s32.totalorder %s52_s12, %s52_s12 }
  0x10   :  { %v34_v11 = vmul.f32 %v26_v8, %v26_v8  ;;  %37 = vst [vmem:[#allocation5] sm:$0xff] %v29_v3  ;;  %38 = vst [vmem:[#allocation5 + $0x8] sm:$0xff] %v30_v4  ;;  %v35_v14 = vmul.f32 %v27_v12, %v27_v12  ;;  %v36_v15 = vmul.f32 %v28_v13, %v28_v13  ;;  %p83_p5 = scmp.ne.s32.totalorder %s52_s12, %s82_s0  ;;  %p88_p7 = scmp.lt.s32.totalorder %s82_s0, %s82_s0 }
  0x11   :  { %39 = vst [vmem:[#allocation5 + $0x10] sm:$0xff] %v31_v5  ;;  %40 = vst [vmem:[#allocation5 + $0x18] sm:$0xff] %v32_v9 }
  0x12   :  { %41 = vst [vmem:[#allocation5 + $0x20] sm:$0xff] %v33_v10  ;;  %42 = vst [vmem:[#allocation5 + $0x28] sm:$0xff] %v34_v11  ;;  %p89_p8 = por %p88_p7, %p87_p6 }
  0x13   :  { %43 = vst [vmem:[#allocation5 + $0x30] sm:$0xff] %v35_v14  ;;  %44 = vst [vmem:[#allocation5 + $0x38] sm:$0xff] %v36_v15 }
  0x14   :  { %p90_p9 = pnand %p89_p8, %p83_p5 }
  0x16   :  { %93 = shalt.err (!%p90_p9)
}
  0x17   :  { %54 = dma.vmem_to_hbm [thread:$0]  %s52_s12, 1024, %s125_s1, [#allocation4]  }
  0x18   :  { %104 = dma.done.wait [#allocation4], 1024  }
  0x19   :  { %105 = vsyncadd [#allocation4], 4294966272 }
  0x1a   :  { %58 = vsyncpa [#allocation3], 1 }
  0x1b   :  { %59 = vsyncpa [#allocation4], 1 }

</bundles_post_ra>
